<compile_context>
chip_gen: v5e
topology: v5e:2x2
jax: 0.10.0
libtpu: 0.0.40
codegen_flags: <defaults>
</compile_context>

<pallas_src>
import functools

import jax
import jax.numpy as jnp
from jax.experimental import pallas as pl
from jax.experimental.pallas import tpu as pltpu

_DEFAULT_VMEM_CAP = 64 * 1024 * 1024  # assume the most restrictive gen (v7x) if query fails


def _round_up(x, m):
    return ((x + m - 1) // m) * m


def _vmem_budget():
    """Returns (scoped vmem limit, pipeline working-set budget) per generation."""
    cap = _DEFAULT_VMEM_CAP
    try:
        info = pltpu.get_tpu_info()
        cap_attr = getattr(info, "vmem_capacity_bytes", None)
        if cap_attr:
            cap = int(cap_attr)
    except Exception:
        pass
    # Half of physical VMEM, never above 64 MiB: ~32 MiB on v7x (64 MiB/core),
    # ~64 MiB on v5e/v6e (128 MiB) where deeper buffering is free.
    vmem_limit = min(cap // 2, 64 * 1024 * 1024)
    # Budget for the pipelined working set (double-buffered in/out tiles plus
    # in-kernel f32 temporaries); leaves ample headroom under the limit.
    budget = min(vmem_limit // 4, 8 * 1024 * 1024)
    return vmem_limit, budget


# ----------------------------------------------------------------------------
# Kernels
# ----------------------------------------------------------------------------
def _ln_rows_kernel(x_ref, w_ref, b_ref, o_ref, *, eps, inv_c):
    # x_ref: (TM, C) tile, reduce over lanes; w_ref / b_ref: full (1, C) in VMEM.
    x = x_ref[...].astype(jnp.float32)
    mu = jnp.sum(x, axis=-1, keepdims=True) * inv_c
    xc = x - mu
    var = jnp.sum(xc * xc, axis=-1, keepdims=True) * inv_c
    inv = jax.lax.rsqrt(var + eps)
    w = w_ref[...].astype(jnp.float32)
    b = b_ref[...].astype(jnp.float32)
    o_ref[...] = (xc * inv * w + b).astype(o_ref.dtype)


def _ln_rows_packed_kernel(x_ref, w_ref, b_ref, o_ref, *, eps, c, inv_c):
    # Lane-packed channels_last: x_ref is (TM, W) with W = k*C = 128; each row
    # holds k independent length-C groups back to back. Per-group stats are
    # computed with an exact f32 segmented reduction (circular doubling inside
    # each C-lane segment via pltpu.roll + lane masks). The running sum ends up
    # broadcast across every lane of its segment, so no broadcast-back step is
    # needed and all loads / stores stay lane-dense (unmasked vst).
    x = x_ref[...].astype(jnp.float32)
    w_lanes = x.shape[-1]
    lane = jax.lax.broadcasted_iota(jnp.int32, (1, w_lanes), 1)
    lane_mod = lane % c  # lane position within its segment (hoisted, reused)

    def segsum(v):
        s = v
        d = 1
        while d < c:
            # Circular shift by d *within* each C-lane segment, expressed with
            # two full-row rolls and a lane select (XLU + VPU, MXU untouched).
            in_seg = pltpu.roll(s, d, axis=1)
            wrap = pltpu.roll(s, (d - c) % w_lanes, axis=1)
            s = s + jnp.where(lane_mod >= d, in_seg, wrap)
            d *= 2
        return s

    mu = segsum(x) * inv_c
    xc = x - mu
    var = segsum(xc * xc) * inv_c
    inv = jax.lax.rsqrt(var + eps)
    w = w_ref[...].astype(jnp.float32)  # (1, W): weight tiled k times
    b = b_ref[...].astype(jnp.float32)
    o_ref[...] = (xc * inv * w + b).astype(o_ref.dtype)


def _ln_channels_kernel(x_ref, w_ref, b_ref, o_ref, *, eps, inv_c):
    # channels_first: x_ref is a (1, C, TL) tile (lanes = flattened spatial
    # axis, reduce over the leading C axis); w_ref / b_ref: full (C, 1) in VMEM.
    x = x_ref[...].astype(jnp.float32)
    mu = jnp.sum(x, axis=1, keepdims=True) * inv_c
    xc = x - mu
    var = jnp.sum(xc * xc, axis=1, keepdims=True) * inv_c
    inv = jax.lax.rsqrt(var + eps)
    w = w_ref[...].astype(jnp.float32)[None]  # (1, C, 1)
    b = b_ref[...].astype(jnp.float32)[None]
    o_ref[...] = (xc * inv * w + b).astype(o_ref.dtype)


# ----------------------------------------------------------------------------
# Tile-size selection (dtype-aware, VMEM-budget + grid-depth driven)
# ----------------------------------------------------------------------------
def _pick_row_tile(n_rows, row_elems, itemsize, budget):
    # Per-row working set across the pipeline: double-buffered in + out tiles
    # (native dtype) plus ~2 f32 temporaries (upcast x, centered x).
    per_row = row_elems * (4 * itemsize + 2 * 4)
    tm = (budget // per_row) // 8 * 8
    tm = max(8, min(tm, 1024))  # roofline saturates well below 1024 rows
    # Keep >= ~8 grid steps when there is enough data so each of v7x's two
    # TensorCores still has >= 2 steps to double-buffer.
    depth_cap = max(8, _round_up(pl.cdiv(n_rows, 8), 8))
    tm = min(tm, depth_cap)
    if tm >= n_rows:
        return n_rows  # single full-extent block (always a legal block shape)
    return tm


def _pick_lane_tile(n_lanes, c, bsz, itemsize, budget):
    per_lane = c * (4 * itemsize + 2 * 4)
    tl = (budget // per_lane) // 128 * 128
    tl = max(128, min(tl, 8 * 128 * 8))  # cap at 8192 lanes
    # Keep total grid (bsz * lane tiles) >= ~8 steps when possible.
    want_tiles = max(1, -(-8 // max(bsz, 1)))
    if want_tiles > 1:
        depth_cap = max(128, _round_up(pl.cdiv(n_lanes, want_tiles), 128))
        tl = min(tl, depth_cap)
    if tl >= n_lanes:
        return n_lanes  # full-extent lane block (legal even if < 128)
    return tl


# ----------------------------------------------------------------------------
# Drivers
# ----------------------------------------------------------------------------
def _layernorm_channels_last(x2d, weight, bias, eps):
    n, c = x2d.shape
    itemsize = x2d.dtype.itemsize
    vmem_limit, budget = _vmem_budget()

    # Lane packing: (n, c) viewed as (n // k, 128) — a pure row-major reshape,
    # no data movement — when c is a power of two < 128 and n % k == 0.
    k = 1
    if 0 < c < 128 and (c & (c - 1)) == 0:
        k_cand = 128 // c
        if n % k_cand == 0 and n // k_cand >= 1:
            k = k_cand

    if k > 1:
        n_p, w_lanes = n // k, k * c
        xp = x2d.reshape(n_p, w_lanes)
        wp = jnp.tile(weight.astype(jnp.float32), (k,)).reshape(1, w_lanes)
        bp = jnp.tile(bias.astype(jnp.float32), (k,)).reshape(1, w_lanes)
        tm = _pick_row_tile(n_p, w_lanes, itemsize, budget)
        kernel = functools.partial(_ln_rows_packed_kernel, eps=eps, c=c, inv_c=1.0 / c)
        y = pl.pallas_call(
            kernel,
            out_shape=jax.ShapeDtypeStruct((n_p, w_lanes), x2d.dtype),
            grid_spec=pltpu.PrefetchScalarGridSpec(
                num_scalar_prefetch=0,
                grid=(pl.cdiv(n_p, tm),),
                in_specs=[
                    pl.BlockSpec((tm, w_lanes), lambda i: (i, 0)),
                    pl.BlockSpec(memory_space=pltpu.MemorySpace.VMEM),
                    pl.BlockSpec(memory_space=pltpu.MemorySpace.VMEM),
                ],
                out_specs=pl.BlockSpec((tm, w_lanes), lambda i: (i, 0)),
            ),
            compiler_params=pltpu.CompilerParams(
                dimension_semantics=("parallel",),
                vmem_limit_bytes=vmem_limit,
            ),
        )(xp, wp, bp)
        return y.reshape(n, c)

    # Fallback: C maps to lanes directly (C a multiple of 128 => lane-dense, or
    # an odd shape we do not lane-pack).
    w2d = weight.astype(jnp.float32).reshape(1, c)
    b2d = bias.astype(jnp.float32).reshape(1, c)
    tm = _pick_row_tile(n, c, itemsize, budget)
    kernel = functools.partial(_ln_rows_kernel, eps=eps, inv_c=1.0 / c)
    return pl.pallas_call(
        kernel,
        out_shape=jax.ShapeDtypeStruct((n, c), x2d.dtype),
        grid_spec=pltpu.PrefetchScalarGridSpec(
            num_scalar_prefetch=0,
            grid=(pl.cdiv(n, tm),),
            in_specs=[
                pl.BlockSpec((tm, c), lambda i: (i, 0)),
                pl.BlockSpec(memory_space=pltpu.MemorySpace.VMEM),
                pl.BlockSpec(memory_space=pltpu.MemorySpace.VMEM),
            ],
            out_specs=pl.BlockSpec((tm, c), lambda i: (i, 0)),
        ),
        compiler_params=pltpu.CompilerParams(
            dimension_semantics=("parallel",),
            vmem_limit_bytes=vmem_limit,
        ),
    )(x2d, w2d, b2d)


def _layernorm_channels_first(x, weight, bias, eps):
    bsz, c, h, w = x.shape
    l = h * w
    x3 = x.reshape(bsz, c, l)  # no transpose: C stays on axis 1
    itemsize = x.dtype.itemsize
    vmem_limit, budget = _vmem_budget()
    tl = _pick_lane_tile(l, c, bsz, itemsize, budget)
    wcol = weight.astype(jnp.float32).reshape(c, 1)
    bcol = bias.astype(jnp.float32).reshape(c, 1)
    kernel = functools.partial(_ln_channels_kernel, eps=eps, inv_c=1.0 / c)
    y = pl.pallas_call(
        kernel,
        out_shape=jax.ShapeDtypeStruct((bsz, c, l), x3.dtype),
        grid_spec=pltpu.PrefetchScalarGridSpec(
            num_scalar_prefetch=0,
            grid=(bsz, pl.cdiv(l, tl)),
            in_specs=[
                pl.BlockSpec((1, c, tl), lambda i, j: (i, 0, j)),
                pl.BlockSpec(memory_space=pltpu.MemorySpace.VMEM),
                pl.BlockSpec(memory_space=pltpu.MemorySpace.VMEM),
            ],
            out_specs=pl.BlockSpec((1, c, tl), lambda i, j: (i, 0, j)),
        ),
        compiler_params=pltpu.CompilerParams(
            dimension_semantics=("parallel", "parallel"),
            vmem_limit_bytes=vmem_limit,
        ),
    )(x3, wcol, bcol)
    return y.reshape(bsz, c, h, w)


# ----------------------------------------------------------------------------
# Module
# ----------------------------------------------------------------------------
class LayerNorm:
    """JAX/Pallas port of the PyTorch LayerNorm (channels_last / channels_first)."""

    def __init__(self, normalized_shape, eps=1e-6, data_format="channels_last"):
        if data_format not in ["channels_last", "channels_first"]:
            raise NotImplementedError
        self.weight = jnp.ones((normalized_shape,), dtype=jnp.float32)
        self.bias = jnp.zeros((normalized_shape,), dtype=jnp.float32)
        self.eps = eps
        self.data_format = data_format
        self.normalized_shape = (normalized_shape,)

    def __call__(self, x):
        C = self.normalized_shape[0]
        if self.data_format == "channels_last":
            assert x.shape[-1] == C
            lead = x.shape[:-1]
            x2d = x.reshape(-1, C)
            y2d = _layernorm_channels_last(x2d, self.weight, self.bias, self.eps)
            return y2d.reshape(*lead, C)
        else:  # channels_first: (B, C, H, W), normalize over C — no transposes.
            assert x.shape[1] == C
            return _layernorm_channels_first(x, self.weight, self.bias, self.eps)


# ----------------------------------------------------------------------------
# Reference + test
# ----------------------------------------------------------------------------
def _ref_channels_first(x, w, b, eps):
    u = jnp.mean(x, axis=1, keepdims=True)
    s = jnp.mean((x - u) ** 2, axis=1, keepdims=True)
    xn = (x - u) / jnp.sqrt(s + eps)
    return w[None, :, None, None] * xn + b[None, :, None, None]


def _ref_channels_last(x, w, b, eps):
    u = jnp.mean(x, axis=-1, keepdims=True)
    s = jnp.mean((x - u) ** 2, axis=-1, keepdims=True)
    xn = (x - u) / jnp.sqrt(s + eps)
    return xn * w + b


if __name__ == "__main__":
    key = jax.random.PRNGKey(0)
    k1, k2, k3, k4, k5, k6 = jax.random.split(key, 6)

    # --- channels_first: x (B=2, C=4, H=16, W=16), normalize over C ---
    C_cf = 4
    x_cf = jax.random.normal(k1, (2, C_cf, 16, 16), dtype=jnp.float32)
    ln_cf = LayerNorm(C_cf, eps=1e-6, data_format="channels_first")
    ln_cf.weight = 0.5 + 0.1 * jnp.arange(C_cf, dtype=jnp.float32)
    ln_cf.bias = 0.01 * jnp.arange(C_cf, dtype=jnp.float32)
    y_cf = jax.block_until_ready(ln_cf(x_cf))
    ref_cf = _ref_channels_first(x_cf, ln_cf.weight, ln_cf.bias, ln_cf.eps)
    assert y_cf.shape == x_cf.shape
    assert jnp.max(jnp.abs(y_cf - ref_cf)) < 1e-4

    # --- channels_last (lane-packed path): x (2, 8, 8, 32), normalize over C ---
    C_cl = 32
    x_cl = jax.random.normal(k2, (2, 8, 8, C_cl), dtype=jnp.float32)
    ln_cl = LayerNorm(C_cl, eps=1e-6, data_format="channels_last")
    ln_cl.weight = 1.0 + 0.05 * jax.random.normal(k3, (C_cl,), dtype=jnp.float32)
    ln_cl.bias = 0.05 * jax.random.normal(k4, (C_cl,), dtype=jnp.float32)
    y_cl = jax.block_until_ready(ln_cl(x_cl))
    ref_cl = _ref_channels_last(x_cl, ln_cl.weight, ln_cl.bias, ln_cl.eps)
    assert y_cl.shape == x_cl.shape
    assert jnp.max(jnp.abs(y_cl - ref_cl)) < 1e-4

    # --- channels_last fallback path + partial edge block: x (1, 3, 5, 32) ---
    x_odd = 2.0 + jax.random.normal(k5, (1, 3, 5, C_cl), dtype=jnp.float32)
    y_odd = jax.block_until_ready(ln_cl(x_odd))
    ref_odd = _ref_channels_last(x_odd, ln_cl.weight, ln_cl.bias, ln_cl.eps)
    assert y_odd.shape == x_odd.shape
    assert jnp.max(jnp.abs(y_odd - ref_odd)) < 1e-4

    # --- channels_first with a partial lane edge block: x (2, 8, 9, 20) ---
    C_cf2 = 8
    x_cf2 = jax.random.normal(k6, (2, C_cf2, 9, 20), dtype=jnp.float32)
    ln_cf2 = LayerNorm(C_cf2, eps=1e-6, data_format="channels_first")
    y_cf2 = jax.block_until_ready(ln_cf2(x_cf2))
    ref_cf2 = _ref_channels_first(x_cf2, ln_cf2.weight, ln_cf2.bias, ln_cf2.eps)
    assert y_cf2.shape == x_cf2.shape
    assert jnp.max(jnp.abs(y_cf2 - ref_cf2)) < 1e-4

    print("KERNEL_OK")
</pallas_src>

<mosaic_0001>
module attributes {stable_mosaic.version = 11 : i64} {
  func.func @_ln_channels_kernel(%arg0: i32, %arg1: i32, %arg2: memref<1x4x128xf32, #tpu.memory_space<vmem>>, %arg3: memref<4x1xf32, #tpu.memory_space<vmem>>, %arg4: memref<4x1xf32, #tpu.memory_space<vmem>>, %arg5: memref<1x4x128xf32, #tpu.memory_space<vmem>>) attributes {dimension_semantics = [#tpu.dimension_semantics<parallel>, #tpu.dimension_semantics<parallel>], iteration_bounds = array<i64: 2, 2>, scalar_prefetch = 0 : i64, scratch_operands = 0 : i64, tpu.core_type = #tpu.core_type<tc>, window_params = [{transform_indices = @transform_0, window_bounds = array<i64: 1, 4, 128>}, {pipeline_mode = #tpu.pipeline_mode<synchronous>, transform_indices = @transform_1, window_bounds = array<i64: 4, 1>}, {pipeline_mode = #tpu.pipeline_mode<synchronous>, transform_indices = @transform_2, window_bounds = array<i64: 4, 1>}, {transform_indices = @transform_3, window_bounds = array<i64: 1, 4, 128>}]} {
    %c0 = arith.constant 0 : index
    %c0_0 = arith.constant 0 : index
    %c0_1 = arith.constant 0 : index
    %0 = vector.load %arg2[%c0, %c0_0, %c0_1] : memref<1x4x128xf32, #tpu.memory_space<vmem>>, vector<1x4x128xf32>
    %cst = arith.constant dense<0.000000e+00> : vector<1x128xf32>
    %1 = vector.multi_reduction <add>, %0, %cst [1] : vector<1x4x128xf32> to vector<1x128xf32>
    %2 = vector.shape_cast %1 : vector<1x128xf32> to vector<1x1x128xf32>
    %cst_2 = arith.constant 2.500000e-01 : f32
    %3 = vector.broadcast %cst_2 : f32 to vector<1x1x128xf32>
    %4 = arith.mulf %2, %3 : vector<1x1x128xf32>
    %5 = vector.broadcast %4 : vector<1x1x128xf32> to vector<1x4x128xf32>
    %6 = arith.subf %0, %5 : vector<1x4x128xf32>
    %7 = arith.mulf %6, %6 : vector<1x4x128xf32>
    %cst_3 = arith.constant dense<0.000000e+00> : vector<1x128xf32>
    %8 = vector.multi_reduction <add>, %7, %cst_3 [1] : vector<1x4x128xf32> to vector<1x128xf32>
    %9 = vector.shape_cast %8 : vector<1x128xf32> to vector<1x1x128xf32>
    %cst_4 = arith.constant 2.500000e-01 : f32
    %10 = vector.broadcast %cst_4 : f32 to vector<1x1x128xf32>
    %11 = arith.mulf %9, %10 : vector<1x1x128xf32>
    %cst_5 = arith.constant 9.99999997E-7 : f32
    %12 = vector.broadcast %cst_5 : f32 to vector<1x1x128xf32>
    %13 = arith.addf %11, %12 : vector<1x1x128xf32>
    %14 = math.rsqrt %13 : vector<1x1x128xf32>
    %c0_6 = arith.constant 0 : index
    %c0_7 = arith.constant 0 : index
    %15 = vector.load %arg3[%c0_6, %c0_7] : memref<4x1xf32, #tpu.memory_space<vmem>>, vector<4x1xf32>
    %16 = vector.shape_cast %15 : vector<4x1xf32> to vector<1x4x1xf32>
    %c0_8 = arith.constant 0 : index
    %c0_9 = arith.constant 0 : index
    %17 = vector.load %arg4[%c0_8, %c0_9] : memref<4x1xf32, #tpu.memory_space<vmem>>, vector<4x1xf32>
    %18 = vector.shape_cast %17 : vector<4x1xf32> to vector<1x4x1xf32>
    %19 = vector.broadcast %14 : vector<1x1x128xf32> to vector<1x4x128xf32>
    %20 = arith.mulf %6, %19 : vector<1x4x128xf32>
    %21 = vector.broadcast %16 : vector<1x4x1xf32> to vector<1x4x128xf32>
    %22 = arith.mulf %20, %21 : vector<1x4x128xf32>
    %23 = vector.broadcast %18 : vector<1x4x1xf32> to vector<1x4x128xf32>
    %24 = arith.addf %22, %23 : vector<1x4x128xf32>
    %c0_10 = arith.constant 0 : index
    %c0_11 = arith.constant 0 : index
    %c0_12 = arith.constant 0 : index
    %25 = vector.load %arg5[%c0_10, %c0_11, %c0_12] : memref<1x4x128xf32, #tpu.memory_space<vmem>>, vector<1x4x128xf32>
    tpu.vector_store %arg5[%c0_10, %c0_11, %c0_12], %24 {strides = array<i32>} : memref<1x4x128xf32, #tpu.memory_space<vmem>>, vector<1x4x128xf32>,
    return
  }
  func.func @transform_0(%arg0: i32, %arg1: i32) -> (i32, i32, i32) {
    %c0_i32 = arith.constant 0 : i32
    %c0_i32_0 = arith.constant 0 : i32
    return %arg0, %c0_i32, %arg1 : i32, i32, i32
  }
  func.func @transform_1(%arg0: i32, %arg1: i32) -> (i32, i32) {
    %c0_i32 = arith.constant 0 : i32
    %c0_i32_0 = arith.constant 0 : i32
    %c0_i32_1 = arith.constant 0 : i32
    return %c0_i32, %c0_i32_0 : i32, i32
  }
  func.func @transform_2(%arg0: i32, %arg1: i32) -> (i32, i32) {
    %c0_i32 = arith.constant 0 : i32
    %c0_i32_0 = arith.constant 0 : i32
    %c0_i32_1 = arith.constant 0 : i32
    return %c0_i32, %c0_i32_0 : i32, i32
  }
  func.func @transform_3(%arg0: i32, %arg1: i32) -> (i32, i32, i32) {
    %c0_i32 = arith.constant 0 : i32
    %c0_i32_0 = arith.constant 0 : i32
    return %arg0, %c0_i32, %arg1 : i32, i32, i32
  }
}

</mosaic_0001>

<bundles_post_ra>
// kernel: tpu_custom_call.1
= control target key start
LH: loop header
LB: loop body
LE: loop exit
PB: predicated region body
PF: predicated region fallthrough
CT: control target
= control target key end

     0   :  { %8 = vsyncpa [#allocation3], 0  ;;  %s756_s0 = inlined_call_operand.hbm [shape: f32[2,4,256], index: 0, kind: input, shape index: {}]   ;;  %s757_s1 = inlined_call_operand.vmem [shape: f32[4,1], index: 1, kind: input, shape index: {}]   ;;  %s758_s2 = inlined_call_operand.vmem [shape: f32[4,1], index: 2, kind: input, shape index: {}]   ;;  %s759_s3 = inlined_call_operand.hbm [shape: f32[2,4,256], index: 3, kind: output, shape index: {}]  }
   0x1   :  { %10 = vsyncpa [#allocation3 + $0x1], 0 }
   0x2   :  { %11 = vsyncpa [#allocation4], 0 }
   0x3   :  { %13 = vsyncpa [#allocation4 + $0x1], 0  ;;  %s604_s12 = smov 0   ;;  %s606_s13 = smov 0  }
   0x4   :  { %s608_s14 = smov 0   ;;  %s610_s15 = smov 0  }
   0x5   :  { %s612_s16 = smov 0   ;;  %s614_s17 = smov 0  }
   0x6   :  { %s616_s18 = smov 0   ;;  %s618_s19 = smov 0  }
   0x7 LB: > { %s356_s20 = sadd.s32 4294967295, %s581_s19   ;;  %s357_s21 = sadd.s32 4294967294, %s581_s19   ;;  %s581_s19 = sphi %s618_s19, %s19_s19   ;;  %s577_s18 = sphi %s616_s18, %s773_s18   ;;  %s573_s17 = sphi %s614_s17, %s772_s17   ;;  %s569_s16 = sphi %s612_s16, %s771_s16   ;;  %s565_s15 = sphi %s610_s15, %s770_s15   ;;  %s561_s14 = sphi %s608_s14, %s769_s14   ;;  %s557_s13 = sphi %s606_s13, %s768_s13   ;;  %s553_s12 = sphi %s604_s12, %s767_s12  }
   0x8   : > { %s28_s22 = sadd.s32 1, %s573_s17  ;;  %s31_s23 = sadd.s32 1, %s577_s18 }
   0x9   : > { %p29_p0 = scmp.ge.s32.totalorder %s28_s22, 2  ;;  %s40_s24 = sadd.s32 1, %s561_s14 }
   0xa   : > { %p47_p1 = scmp.ne.s32.totalorder %s561_s14, %s557_s13  ;;  %p48_p2 = scmp.eq.s32.totalorder %s581_s19, 0 }
   0xb   : > { %s775_s22 = smov (%p29_p0, %s28_s22), 0  ;;  %s777_s23 = smov (!%p29_p0, %s31_s23), %s577_s18 }
   0xc   : > { %s36_s25 = ssub.s32 %s573_s17, %s775_s22  ;;  %p657_p3 = por %p48_p2, %p47_p1 }
   0xd   : > { %p33_p4 = scmp.ge.s32.totalorder %s777_s23, 2  ;;  %p53_p5 = scmp.ne.s32.totalorder %s557_s13, %s553_s12 }
   0xe   : > { %p54_p6 = scmp.eq.s32.totalorder %s356_s20, 0  ;;  %p121_p7 = scmp.eq.s32.totalorder %s356_s20, 3 }
   0xf   : > { %s779_s23 = smov (%p33_p4, %s777_s23), 0  ;;  %p127_p10 = scmp.eq.s32.totalorder %s357_s21, 3 }
  0x10   : > { %762 = sst [smem:[#allocation8_spill]] %s779_s23  ;;  %p665_p8 = por %p54_p6, %p53_p5 }
  0x11   : > { %p669_p9 = por %p121_p7, %p47_p1  ;;  %s35_s29 = ssub.s32 %s577_s18, %s779_s23 }
  0x12   : > { %s37_s30 = sor.u32 %s36_s25, %s35_s29  ;;  %p675_p12 = por %p127_p10, %p53_p5 }
  0x13   : > { %p38_p11 = scmp.eq.s32.totalorder %s37_s30, 0  ;;  %p383_p13 = scmp.lt.s32.totalorder %s581_s19, 4 }
  0x14   : > { %s153_s5 = sand.u32 1, %s561_s14   ;;  %s361_s8 = sshll.u32 %s577_s18, 1 }
  0x15   : > { %s682_s6 = scalar_select %p38_p11, %s561_s14, %s40_s24  }
  0x16   : > { %s360_s7 = sshll.u32 %s153_s5, 2  ;;  %s161_s9 = sadd.s32 %s573_s17, %s361_s8 }
  0x17   : > { %s157_s10 = scalar_lea.vmem [#allocation2], %s360_s7  ;;  %s362_s20 = sshll.u32 %s161_s9, 2 }
  0x18   : > { %s167_s11 = sshll.u32 %s157_s10, 4  ;;  %s163_s29 = scalar_lea.hbm %s756_s0, %s362_s20  ;;  %s168_s11 = int_to_ptr.vmem [resolvable:$true] %s167_s11 }
  0x19   : > { %p376_p0 = pnand %p383_p13, %p657_p3  ;;  %s165_s30 = sshll.u32 %s163_s29, 4  ;;  %s166_s30 = int_to_ptr.hbm [resolvable:$true] %s165_s30 }
  0x1a   : > { %p363_p1 = scmp.ge.s32.totalorder %s581_s19, 1  ;;  %s154_s23 = scalar_lea.sflag [#allocation3], %s153_s5 }
  0x1b   : > { %378 = dma.hbm_to_vmem [thread:$0]  (!%p376_p0), %s166_s30, 64, %s168_s11, %s154_s23  }
  0x1c   : > { %p172_p2 = scmp.lt.s32.totalorder %s581_s19, 5 }
  0x1e   : > { %p173_p4 = pnand %p363_p1, %p172_p2 }
  0x1f   : > { %s694_s24 = sand.u32 (!%p173_p4), 1, %s557_s13  }
  0x20   : > { %176 = sbr.rel (%p173_p4) target bundleno = 168 (0xa8), region = 32  ;;  %s364_s7 = sshll.u32 (!%p173_p4), %s694_s24, 2 }
  0x21   : > { %s179_s8 = scalar_lea.sflag (!%p173_p4), [#allocation3], %s694_s24  ;;  %s182_s26 = scalar_lea.vmem (!%p173_p4), [#allocation2], %s364_s7 }
  0x25   : > { %544 = dma.done.wait (%p665_p8), %s179_s8, 64  }
  0x26   : > { %546 = vsyncadd (%p665_p8), %s179_s8, 4294967232  ;;  %v583_v0 = vmov 0   ;;  %v237_v1 = vld [vmem:[%s757_s1] sm:$0xf]  ;;  %vm207_vm0 = vcmask 1043456   ;;  %s367_s27 = sshll.u32 %s569_s16, 1 }
  0x27   : > { %450 = vset.pattern.permute.xlu0 %v583_v0  ;;  %v238_v2 = vld [vmem:[%s758_s2] sm:$0xf]  ;;  %s264_s11 = sadd.s32 %s565_s15, %s367_s27  ;;  %s205_s30 = scalar_lea.vmem [#allocation5], %s364_s7 }
  0x28   : > { %242 = vperm.xlu0 %450, %v237_v1   ;;  %v206_v3 = vld [vmem:[%s182_s26] sm:$0xf]  ;;  %s368_s20 = sshll.u32 %s264_s11, 2  ;;  %s268_s8 = sshll.u32 %s205_s30, 4  ;;  %s269_s8 = int_to_ptr.vmem [resolvable:$true] %s268_s8 }
  0x29   : > { %v208_v4 = vsel %vm207_vm0, %v206_v3, 0.0  ;;  %s266_s29 = scalar_lea.hbm %s759_s3, %s368_s20  ;;  %s254_s15 = scalar_lea.sflag [#allocation4], %s694_s24 }
  0x2a   : > { %v209_v5 = vrot.slane %v208_v4, 4  ;;  %s270_s26 = sshll.u32 %s266_s29, 4  ;;  %s503_s7 = scalar_lea.hbm %s759_s3, 16  ;;  %s271_s26 = int_to_ptr.hbm [resolvable:$true] %s270_s26 }
  0x2b   : > { %s497_s16 = sshra.s32 %s271_s26, 4  ;;  %s498_s16 = int_to_ptr.hbm [resolvable:$true] %s497_s16 }
  0x2c   : > { %v210_v6 = vadd.f32 %v209_v5, %v208_v4  ;;  %s499_s23 = scalar_lea.hbm %s498_s16, 4  ;;  %p504_p7 = scmp.lt.s32.totalorder %s498_s16, %s759_s3 }
  0x2d   : > { %p500_p3 = scmp.ne.s32.totalorder %s498_s16, %s499_s23  ;;  %p505_p8 = scmp.lt.s32.totalorder %s503_s7, %s499_s23 }
  0x2e   : > { %v211_v7 = vrot.slane %v210_v6, 2 }
  0x2f   : > { %p501_p5 = pnand %p500_p3, %p669_p9  ;;  %p506_p10 = por %p505_p8, %p504_p7 }
  0x30   : > { %248 = vperm.xlu0 %450, %v238_v2   ;;  %v212_v8 = vadd.f32 %v211_v7, %v210_v6 }
  0x31   : > { %p502_p6 = pneg %p501_p5 }
  0x32   : > { %v213_v9 = vrot.slane %v212_v8, 1 }
  0x33   : > { %p507_p11 = pnand %p506_p10, %p502_p6 }
  0x34   : > { %v214_v10 = vadd.f32 %v213_v9, %v212_v8 }
  0x36   : > { %v215_v11 = vmul.f32 0.25, %v214_v10 }
  0x38   : > { %v216_v12 = vsub.f32 %v206_v3, %v215_v11 }
  0x3a   : > { %v217_v13 = vmul.f32 %v216_v12, %v216_v12 }
  0x3c   : > { %v218_v14 = vsel %vm207_vm0, %v217_v13, 0.0 }
  0x3d   : > { %v219_v15 = vrot.slane %v218_v14, 4 }
  0x3f   : > { %v220_v16 = vadd.f32 %v219_v15, %v218_v14 }
  0x41   : > { %v221_v17 = vrot.slane %v220_v16, 2 }
  0x43   : > { %v222_v18 = vadd.f32 %v221_v17, %v220_v16 }
  0x45   : > { %v223_v19 = vrot.slane %v222_v18, 1 }
  0x47   : > { %v224_v20 = vadd.f32 %v223_v19, %v222_v18 }
  0x49   : > { %v225_v21 = vmul.f32 0.25, %v224_v20 }
  0x4b   : > { %v226_v22 = vadd.f32 1e-06, %v225_v21 }
  0x4d   : > { %451 = vrsqrt.f32 %v226_v22  ;;  %vm233_vm1 = vweird.f32 %v226_v22 }
  0x53   : > { %v452_v23 = vpop.eup %451 }
  0x54   : > { %v228_v24 = vmul.f32 %v452_v23, %v226_v22  ;;  %vm234_vm2 = vweird.f32 %v452_v23 }
  0x55   : > { %vm235_vm3 = vmor %vm233_vm1, %vm234_vm2 }
  0x56   : > { %v229_v25 = vmul.f32 %v452_v23, %v228_v24 }
  0x58   : > { %v230_v26 = vmul.f32 0.5, %v229_v25 }
  0x5a   : > { %v231_v27 = vsub.f32 1.5, %v230_v26 }
  0x5c   : > { %v232_v28 = vmul.f32 %v452_v23, %v231_v27 }
  0x5e   : > { %v236_v30 = vsel %vm235_vm3, %v452_v23, %v232_v28 }
  0x5f   : > { %v239_v31 = vmul.f32 %v236_v30, %v216_v12 }
  0x9a   : > { %v243_v29 = vpop.permute.xlu0 %242 }
  0x9b   : > { %v245_v32 = vmul.f32 %v243_v29, %v239_v31 }
  0xa2   : > { %v249_v33 = vpop.permute.xlu0 %248 }
  0xa3   : > { %v251_v34 = vadd.f32 %v249_v33, %v245_v32 }
  0xa5   : > { %252 = vst [vmem:[%s205_s30] sm:$0xf] %v251_v34 }
  0xa6   : > { %510 = shalt.err (!%p507_p11)
}
  0xa7   : > { %373 = dma.vmem_to_hbm [thread:$0]  (%p669_p9), %s269_s8, 64, %s271_s26, %s254_s15  }
  0xa8 PF: > { %p384_p13 = scmp.ge.s32.totalorder %s581_s19, 2  ;;  %s282_s24 = sand.u32 1, %s553_s12  }
  0xa9   : > { %s283_s11 = scalar_lea.sflag [#allocation4], %s282_s24 }
  0xaa   : > { %p380_p0 = pnand %p384_p13, %p675_p12 }
  0xac   : > { %p381_p1 = pneg %p380_p0 }
  0xae   : > { %548 = dma.done.wait (%p381_p1), %s283_s11, 64  }
  0xaf   : > { %550 = vsyncadd (%p381_p1), %s283_s11, 4294967232  ;;  %s19_s19 = sadd.s32 1, %s581_s19   ;;  %s766_s28 = sld [smem:[#allocation8_spill]] }
  0xb0   : > { %p16_p2 = scmp.ge.s32.totalorder %s19_s19, 6   ;;  %s767_s12 = smov %s557_s13 }
  0xb1   : > { %s768_s13 = smov %s561_s14  ;;  %s769_s14 = smov %s682_s6 }
  0xb2   : > { %s770_s15 = smov %s573_s17  ;;  %s771_s16 = smov %s577_s18 }
  0xb3   : > { %s772_s17 = smov %s775_s22  ;;  %18 = sbr.rel (!%p16_p2) target bundleno = 7 (0x7), region = 77 }
  0xb5   : > { %s773_s18 = smov %s766_s28 }
  0xb8   :  { %289 = vsyncpa [#allocation3], 1 }
  0xb9   :  { %291 = vsyncpa [#allocation3 + $0x1], 1 }
  0xba   :  { %292 = vsyncpa [#allocation4], 1 }
  0xbb   :  { %294 = vsyncpa [#allocation4 + $0x1], 1 }

</bundles_post_ra>
